<compile_context>
chip_gen: v6e
topology: v6e:2x2x1
jax: 0.10.0
libtpu: 0.0.40
codegen_flags: <defaults>
</compile_context>

<pallas_src>
import math
from functools import partial

import jax
import jax.numpy as jnp
from jax import lax
from jax.experimental import pallas as pl
from jax.experimental.pallas import tpu as pltpu


# ---------------------------------------------------------------------------
# helpers
# ---------------------------------------------------------------------------
def _choose_tile(dim, preferred):
    """Largest tile <= preferred that evenly divides `dim` (multiple of 8)."""
    if dim <= preferred:
        return dim
    for t in range(preferred, 7, -8):
        if dim % t == 0:
            return t
    return dim


# ---------------------------------------------------------------------------
# Kernel 1: fused QKV projection (scale already folded into W_q / b_q)
# ---------------------------------------------------------------------------
def _qkv_proj_kernel(x_ref, wqkv_ref, bqkv_ref, q_ref, k_ref, v_ref, *, d_k):
    """
    x_ref    : (row_tile, D)
    wqkv_ref : (3*d_k, D)   [W_q/sqrt(dh); W_k; W_v] in nn.Linear (out,in) layout
    bqkv_ref : (1, 3*d_k)   f32
    q/k/v    : (row_tile, d_k)
    """
    x = x_ref[...].astype(wqkv_ref.dtype)
    qkv = lax.dot_general(x, wqkv_ref[...], (((1,), (1,)), ((), ())),
                          preferred_element_type=jnp.float32) + bqkv_ref[...]
    q_ref[...] = qkv[:, 0 * d_k:1 * d_k].astype(q_ref.dtype)
    k_ref[...] = qkv[:, 1 * d_k:2 * d_k].astype(k_ref.dtype)
    v_ref[...] = qkv[:, 2 * d_k:3 * d_k].astype(v_ref.dtype)


# ---------------------------------------------------------------------------
# Kernel 2: KV-tiled online-softmax attention + fused output projection
# ---------------------------------------------------------------------------
def _flash_mha_kernel(q_ref, k_ref, v_ref, wo_ref, bo_ref, o_ref,
                      m_scr, l_scr, acc_scr, *, num_heads, head_dim):
    """
    q_ref : (tq, d_k)  scaled Q tile (resident across the kv axis)
    k_ref : (tk, d_k)
    v_ref : (tk, d_k)
    wo_ref: (D, d_k)   bo_ref: (1, D)
    o_ref : (tq, D)    written only at the last kv step
    m_scr : (H, tq, 1) running max      (f32)
    l_scr : (H, tq, 1) running sum      (f32)
    acc_scr: (tq, d_k) un-normalized PV accumulator, heads concatenated in lanes
    """
    ki = pl.program_id(2)

    @pl.when(ki == 0)
    def _init():
        m_scr[...] = jnp.full(m_scr.shape, -jnp.inf, m_scr.dtype)
        l_scr[...] = jnp.zeros(l_scr.shape, l_scr.dtype)
        acc_scr[...] = jnp.zeros(acc_scr.shape, acc_scr.dtype)

    q = q_ref[...]          # scale already folded into W_q
    k = k_ref[...]
    v = v_ref[...]

    for h in range(num_heads):
        lo = h * head_dim
        hi = lo + head_dim
        qh = q[:, lo:hi]
        kh = k[:, lo:hi]
        vh = v[:, lo:hi]

        # scores = Qh Kh^T  (contract last dims; f32 accumulation on the MXU)
        s = lax.dot_general(qh, kh, (((1,), (1,)), ((), ())),
                            preferred_element_type=jnp.float32)       # (tq, tk)

        m_prev = m_scr[h]                                              # (tq, 1)
        l_prev = l_scr[h]
        m_new = jnp.maximum(m_prev, jnp.max(s, axis=-1, keepdims=True))
        alpha = jnp.exp(m_prev - m_new)
        p = jnp.exp(s - m_new)                                         # UN-normalized

        l_scr[h] = alpha * l_prev + jnp.sum(p, axis=-1, keepdims=True)
        m_scr[h] = m_new
        # Deferred normalization: accumulate p @ V; divide by l only at the end.
        acc_scr[:, lo:hi] = (
            alpha * acc_scr[:, lo:hi]
            + jnp.dot(p.astype(v.dtype), vh, preferred_element_type=jnp.float32))

    @pl.when(ki == pl.num_programs(2) - 1)
    def _finalize():
        # Normalize each head with one (tq, head_dim) multiply (exact reciprocal
        # to preserve tight agreement with the f32 reference).
        for h in range(num_heads):
            lo = h * head_dim
            hi = lo + head_dim
            inv_l = pl.reciprocal(l_scr[h], approx=False)              # (tq, 1)
            acc_scr[:, lo:hi] = acc_scr[:, lo:hi] * inv_l
        # Fused output projection: heads are already lane-concatenated in acc.
        o_cat = acc_scr[...].astype(wo_ref.dtype)
        y = lax.dot_general(o_cat, wo_ref[...], (((1,), (1,)), ((), ())),
                            preferred_element_type=jnp.float32) + bo_ref[...]
        o_ref[...] = y.astype(o_ref.dtype)


# ---------------------------------------------------------------------------
# One-time parameter preparation (hoisted out of the per-call path)
# ---------------------------------------------------------------------------
def prepare_params(params, num_heads, d_k, *, mxu_dtype=None):
    """Fuse QKV weights, fold 1/sqrt(head_dim) into W_q/b_q, reshape biases.

    Pass mxu_dtype=jnp.bfloat16 for peak MXU rate on v5e/v6e/v7x (softmax and
    accumulation stay f32 inside the kernels); leave None to keep f32 exactly.
    """
    head_dim = d_k // num_heads
    scale = 1.0 / math.sqrt(head_dim)
    wq, bq = params["W_q"]
    wk, bk = params["W_k"]
    wv, bv = params["W_v"]
    wo, bo = params["W_o"]

    w_qkv = jnp.concatenate([wq * scale, wk, wv], axis=0)            # (3*d_k, D)
    b_qkv = jnp.concatenate([bq * scale, bk, bv], axis=0)[None]      # (1, 3*d_k)
    b_o = bo[None]                                                   # (1, D)
    if mxu_dtype is not None:
        w_qkv = w_qkv.astype(mxu_dtype)
        wo = wo.astype(mxu_dtype)
    return {
        "W_qkv": w_qkv,
        "b_qkv": b_qkv.astype(jnp.float32),
        "W_o": wo,
        "b_o": b_o.astype(jnp.float32),
    }


# ---------------------------------------------------------------------------
# Forward pass
# ---------------------------------------------------------------------------
def multi_head_attention(x, prepared, num_heads, d_k, *,
                         row_tile=256, q_tile=256, kv_tile=256):
    B, S, D = x.shape
    assert d_k % num_heads == 0
    head_dim = d_k // num_heads

    w_qkv = prepared["W_qkv"]
    b_qkv = prepared["b_qkv"]
    wo = prepared["W_o"]
    b_o = prepared["b_o"]
    compute_dtype = w_qkv.dtype        # MXU operand dtype for Q/K/V activations

    # Tile sizes: sized for v7x's 64 MiB VMEM; _choose_tile shrinks to the
    # actual sequence length for small problems.
    tr = _choose_tile(S, row_tile)
    tq = _choose_tile(S, q_tile)
    tk = _choose_tile(S, kv_tile)

    # Explicit scoped-VMEM budget computed from block sizes + buffering.
    def _isz(dt):
        return jnp.dtype(dt).itemsize

    f32b = 4
    proj_bytes = (2 * tr * D * _isz(x.dtype)                 # x blocks (2 bufs)
                  + (3 * d_k) * D * _isz(w_qkv.dtype)        # W_qkv (1 buf)
                  + (3 * d_k) * f32b                         # b_qkv
                  + 2 * 3 * tr * d_k * _isz(compute_dtype))  # q/k/v out blocks
    flash_bytes = (2 * (tq + 2 * tk) * d_k * _isz(compute_dtype)   # q/k/v blocks
                   + D * d_k * _isz(wo.dtype) + D * f32b           # W_o, b_o
                   + 2 * tq * D * _isz(x.dtype)                    # out blocks
                   + tq * d_k * f32b                               # acc scratch
                   + 2 * num_heads * tq * f32b                     # m/l scratch
                   + tq * tk * f32b)                               # live score tile
    vmem_limit = int(min(max(2 * max(proj_bytes, flash_bytes), 8 * 1024 * 1024),
                         64 * 1024 * 1024))

    # ---- Kernel 1: fused QKV projection --------------------------------
    q, k, v = pl.pallas_call(
        partial(_qkv_proj_kernel, d_k=d_k),
        out_shape=(
            jax.ShapeDtypeStruct((B, S, d_k), compute_dtype),
            jax.ShapeDtypeStruct((B, S, d_k), compute_dtype),
            jax.ShapeDtypeStruct((B, S, d_k), compute_dtype),
        ),
        grid=(B, S // tr),
        in_specs=[
            pl.BlockSpec((None, tr, D), lambda b, r: (b, r, 0)),
            pl.BlockSpec((3 * d_k, D), lambda b, r: (0, 0),
                         pipeline_mode=pl.Buffered(1)),
            pl.BlockSpec((1, 3 * d_k), lambda b, r: (0, 0),
                         pipeline_mode=pl.Buffered(1)),
        ],
        out_specs=(
            pl.BlockSpec((None, tr, d_k), lambda b, r: (b, r, 0)),
            pl.BlockSpec((None, tr, d_k), lambda b, r: (b, r, 0)),
            pl.BlockSpec((None, tr, d_k), lambda b, r: (b, r, 0)),
        ),
        compiler_params=pltpu.CompilerParams(
            dimension_semantics=("parallel", "parallel"),
            vmem_limit_bytes=vmem_limit),
    )(x, w_qkv, b_qkv)

    # ---- Kernel 2: flash attention + fused output projection -----------
    out = pl.pallas_call(
        partial(_flash_mha_kernel, num_heads=num_heads, head_dim=head_dim),
        out_shape=jax.ShapeDtypeStruct((B, S, D), x.dtype),
        grid=(B, S // tq, S // tk),                # kv axis LAST
        in_specs=[
            pl.BlockSpec((None, tq, d_k), lambda b, qi, ki: (b, qi, 0)),
            pl.BlockSpec((None, tk, d_k), lambda b, qi, ki: (b, ki, 0)),
            pl.BlockSpec((None, tk, d_k), lambda b, qi, ki: (b, ki, 0)),
            pl.BlockSpec((D, d_k), lambda b, qi, ki: (0, 0),
                         pipeline_mode=pl.Buffered(1)),
            pl.BlockSpec((1, D), lambda b, qi, ki: (0, 0),
                         pipeline_mode=pl.Buffered(1)),
        ],
        out_specs=pl.BlockSpec((None, tq, D), lambda b, qi, ki: (b, qi, 0)),
        scratch_shapes=[
            pltpu.VMEM((num_heads, tq, 1), jnp.float32),   # running max m
            pltpu.VMEM((num_heads, tq, 1), jnp.float32),   # running sum l
            pltpu.VMEM((tq, d_k), jnp.float32),            # PV accumulator
        ],
        compiler_params=pltpu.CompilerParams(
            dimension_semantics=("parallel", "parallel", "arbitrary"),
            vmem_limit_bytes=vmem_limit),
    )(q, k, v, wo, b_o)
    return out


# ---------------------------------------------------------------------------
# Param init (matches nn.Linear: W (out, in), b (out,)) and pure-JAX reference
# ---------------------------------------------------------------------------
def init_params(key, input_dim, d_k):
    def lin(key, fan_in, fan_out):
        k1, k2 = jax.random.split(key)
        bound = 1.0 / math.sqrt(fan_in)
        w = jax.random.uniform(k1, (fan_out, fan_in), jnp.float32, -bound, bound)
        b = jax.random.uniform(k2, (fan_out,), jnp.float32, -bound, bound)
        return w, b

    kq, kk, kv, ko = jax.random.split(key, 4)
    return {
        "W_q": lin(kq, input_dim, d_k),
        "W_k": lin(kk, input_dim, d_k),
        "W_v": lin(kv, input_dim, d_k),
        "W_o": lin(ko, d_k, input_dim),
    }


def reference(x, params, num_heads, d_k):
    B, S, D = x.shape
    dh = d_k // num_heads

    def lin(y, w, b):
        return jnp.einsum("bsi,oi->bso", y, w, precision="highest") + b

    def heads(y):
        return y.reshape(B, S, num_heads, dh).transpose(0, 2, 1, 3)

    q = heads(lin(x, *params["W_q"]))
    k = heads(lin(x, *params["W_k"]))
    v = heads(lin(x, *params["W_v"]))
    s = jnp.einsum("bhqd,bhkd->bhqk", q, k,
                   precision="highest") / jnp.sqrt(jnp.float32(dh))
    p = jax.nn.softmax(s, axis=-1)
    o = jnp.einsum("bhqk,bhkd->bhqd", p, v, precision="highest")
    o = o.transpose(0, 2, 1, 3).reshape(B, S, d_k)
    return lin(o, *params["W_o"])


if __name__ == "__main__":
    B, S, input_dim, num_heads, d_k = 2, 8, 32, 4, 32

    key = jax.random.PRNGKey(0)
    kx, kp = jax.random.split(key)
    x = jax.random.normal(kx, (B, S, input_dim), jnp.float32)
    params = init_params(kp, input_dim, d_k)

    # One-time prep (weight fusion + scale fold); f32 MXU operands here so the
    # result matches the f32 reference tightly.  Pass mxu_dtype=jnp.bfloat16
    # for production-speed MXU matmuls (relaxes tolerance).
    prepared = prepare_params(params, num_heads, d_k)

    out = multi_head_attention(x, prepared, num_heads, d_k)
    out = jax.block_until_ready(out)

    ref = reference(x, params, num_heads, d_k)
    assert out.shape == (B, S, input_dim)
    assert jnp.allclose(out, ref, atol=1e-4, rtol=1e-4), "mismatch vs reference"

    print("KERNEL_OK")
</pallas_src>

<mosaic_0001>
module attributes {stable_mosaic.version = 11 : i64} {
  func.func @_qkv_proj_kernel(%arg0: i32, %arg1: i32, %arg2: memref<1x8x32xf32, #tpu.memory_space<vmem>>, %arg3: memref<96x32xf32, #tpu.memory_space<vmem>>, %arg4: memref<1x96xf32, #tpu.memory_space<vmem>>, %arg5: memref<1x8x32xf32, #tpu.memory_space<vmem>>, %arg6: memref<1x8x32xf32, #tpu.memory_space<vmem>>, %arg7: memref<1x8x32xf32, #tpu.memory_space<vmem>>) attributes {dimension_semantics = [#tpu.dimension_semantics<parallel>, #tpu.dimension_semantics<parallel>], iteration_bounds = array<i64: 2, 1>, scalar_prefetch = 0 : i64, scratch_operands = 0 : i64, tpu.core_type = #tpu.core_type<tc>, window_params = [{transform_indices = @transform_0, window_bounds = array<i64: 1, 8, 32>}, {pipeline_mode = #tpu.pipeline_mode<synchronous>, transform_indices = @transform_1, window_bounds = array<i64: 96, 32>}, {pipeline_mode = #tpu.pipeline_mode<synchronous>, transform_indices = @transform_2, window_bounds = array<i64: 1, 96>}, {transform_indices = @transform_3, window_bounds = array<i64: 1, 8, 32>}, {transform_indices = @transform_4, window_bounds = array<i64: 1, 8, 32>}, {transform_indices = @transform_5, window_bounds = array<i64: 1, 8, 32>}]} {
    %c0 = arith.constant 0 : index
    %c0_0 = arith.constant 0 : index
    %c0_1 = arith.constant 0 : index
    %0 = vector.load %arg2[%c0, %c0_0, %c0_1] : memref<1x8x32xf32, #tpu.memory_space<vmem>>, vector<1x8x32xf32>
    %1 = vector.shape_cast %0 : vector<1x8x32xf32> to vector<8x32xf32>
    %c0_2 = arith.constant 0 : index
    %c0_3 = arith.constant 0 : index
    %2 = vector.load %arg3[%c0_2, %c0_3] : memref<96x32xf32, #tpu.memory_space<vmem>>, vector<96x32xf32>
    %cst = arith.constant dense<0.000000e+00> : vector<8x96xf32>
    %3 = tpu.matmul %1, %2, %cst {dimension_numbers = #tpu.dot_dimension_numbers<[1], [1], [0], [0], [0, 0, 1, 0], [], []>} : vector<8x32xf32>, vector<96x32xf32>, vector<8x96xf32> -> vector<8x96xf32>
    %c0_4 = arith.constant 0 : index
    %c0_5 = arith.constant 0 : index
    %4 = vector.load %arg4[%c0_4, %c0_5] : memref<1x96xf32, #tpu.memory_space<vmem>>, vector<1x96xf32>
    %5 = vector.broadcast %4 : vector<1x96xf32> to vector<8x96xf32>
    %6 = arith.addf %3, %5 : vector<8x96xf32>
    %7 = vector.extract_strided_slice %6 {offsets = [0, 0], sizes = [8, 32], strides = [1, 1]} : vector<8x96xf32> to vector<8x32xf32>
    %c0_6 = arith.constant 0 : index
    %c0_7 = arith.constant 0 : index
    %c0_8 = arith.constant 0 : index
    %8 = vector.load %arg5[%c0_6, %c0_7, %c0_8] : memref<1x8x32xf32, #tpu.memory_space<vmem>>, vector<1x8x32xf32>
    %9 = vector.shape_cast %8 : vector<1x8x32xf32> to vector<8x32xf32>
    %10 = vector.shape_cast %7 : vector<8x32xf32> to vector<1x8x32xf32>
    tpu.vector_store %arg5[%c0_6, %c0_7, %c0_8], %10 {strides = array<i32>} : memref<1x8x32xf32, #tpu.memory_space<vmem>>, vector<1x8x32xf32>,
    %11 = vector.extract_strided_slice %6 {offsets = [0, 32], sizes = [8, 32], strides = [1, 1]} : vector<8x96xf32> to vector<8x32xf32>
    %c0_9 = arith.constant 0 : index
    %c0_10 = arith.constant 0 : index
    %c0_11 = arith.constant 0 : index
    %12 = vector.load %arg6[%c0_9, %c0_10, %c0_11] : memref<1x8x32xf32, #tpu.memory_space<vmem>>, vector<1x8x32xf32>
    %13 = vector.shape_cast %12 : vector<1x8x32xf32> to vector<8x32xf32>
    %14 = vector.shape_cast %11 : vector<8x32xf32> to vector<1x8x32xf32>
    tpu.vector_store %arg6[%c0_9, %c0_10, %c0_11], %14 {strides = array<i32>} : memref<1x8x32xf32, #tpu.memory_space<vmem>>, vector<1x8x32xf32>,
    %15 = vector.extract_strided_slice %6 {offsets = [0, 64], sizes = [8, 32], strides = [1, 1]} : vector<8x96xf32> to vector<8x32xf32>
    %c0_12 = arith.constant 0 : index
    %c0_13 = arith.constant 0 : index
    %c0_14 = arith.constant 0 : index
    %16 = vector.load %arg7[%c0_12, %c0_13, %c0_14] : memref<1x8x32xf32, #tpu.memory_space<vmem>>, vector<1x8x32xf32>
    %17 = vector.shape_cast %16 : vector<1x8x32xf32> to vector<8x32xf32>
    %18 = vector.shape_cast %15 : vector<8x32xf32> to vector<1x8x32xf32>
    tpu.vector_store %arg7[%c0_12, %c0_13, %c0_14], %18 {strides = array<i32>} : memref<1x8x32xf32, #tpu.memory_space<vmem>>, vector<1x8x32xf32>,
    return
  }
  func.func @transform_0(%arg0: i32, %arg1: i32) -> (i32, i32, i32) {
    %c0_i32 = arith.constant 0 : i32
    %c0_i32_0 = arith.constant 0 : i32
    return %arg0, %arg1, %c0_i32 : i32, i32, i32
  }
  func.func @transform_1(%arg0: i32, %arg1: i32) -> (i32, i32) {
    %c0_i32 = arith.constant 0 : i32
    %c0_i32_0 = arith.constant 0 : i32
    %c0_i32_1 = arith.constant 0 : i32
    return %c0_i32, %c0_i32_0 : i32, i32
  }
  func.func @transform_2(%arg0: i32, %arg1: i32) -> (i32, i32) {
    %c0_i32 = arith.constant 0 : i32
    %c0_i32_0 = arith.constant 0 : i32
    %c0_i32_1 = arith.constant 0 : i32
    return %c0_i32, %c0_i32_0 : i32, i32
  }
  func.func @transform_3(%arg0: i32, %arg1: i32) -> (i32, i32, i32) {
    %c0_i32 = arith.constant 0 : i32
    %c0_i32_0 = arith.constant 0 : i32
    return %arg0, %arg1, %c0_i32 : i32, i32, i32
  }
  func.func @transform_4(%arg0: i32, %arg1: i32) -> (i32, i32, i32) {
    %c0_i32 = arith.constant 0 : i32
    %c0_i32_0 = arith.constant 0 : i32
    return %arg0, %arg1, %c0_i32 : i32, i32, i32
  }
  func.func @transform_5(%arg0: i32, %arg1: i32) -> (i32, i32, i32) {
    %c0_i32 = arith.constant 0 : i32
    %c0_i32_0 = arith.constant 0 : i32
    return %arg0, %arg1, %c0_i32 : i32, i32, i32
  }
}

</mosaic_0001>

<bundles_post_ra>
// kernel: tpu_custom_call.1
= control target key start
LH: loop header
LB: loop body
LE: loop exit
PB: predicated region body
PF: predicated region fallthrough
CT: control target
= control target key end

     0   :  { %11 = vsyncpa [#allocation3], 0  ;;  %s1142_s0 = inlined_call_operand.vmem [shape: f32[2,8,32], index: 0, kind: input, shape index: {}]   ;;  %s1143_s1 = inlined_call_operand.vmem [shape: f32[96,32], index: 1, kind: input, shape index: {}]   ;;  %s1144_s2 = inlined_call_operand.vmem [shape: f32[1,96], index: 2, kind: input, shape index: {}]   ;;  %s1145_s3 = inlined_call_operand.hbm [shape: f32[2,8,32], index: 3, kind: output, shape index: {0}]   ;;  %s1146_s4 = inlined_call_operand.hbm [shape: f32[2,8,32], index: 4, kind: output, shape index: {1}]   ;;  %s1147_s5 = inlined_call_operand.hbm [shape: f32[2,8,32], index: 5, kind: output, shape index: {2}]  }
   0x1   :  { %13 = vsyncpa [#allocation3 + $0x1], 0 }
   0x2   :  { %14 = vsyncpa [#allocation5], 0 }
   0x3   :  { %16 = vsyncpa [#allocation5 + $0x1], 0  ;;  %s905_s18 = smov 0   ;;  %s907_s19 = smov 0  }
   0x4   :  { %s909_s20 = smov 0   ;;  %s911_s21 = smov 0  }
   0x5   :  { %s913_s22 = smov 0   ;;  %s915_s23 = smov 0  }
   0x6 LB: > { %s594_s24 = sadd.s32 4294967295, %s866_s23   ;;  %s1148_s25 = sadd.s32 4294967294, %s866_s23   ;;  %s866_s23 = sphi %s915_s23, %s22_s23   ;;  %s862_s22 = sphi %s913_s22, %s1158_s22   ;;  %s858_s21 = sphi %s911_s21, %s1157_s21   ;;  %s854_s20 = sphi %s909_s20, %s1156_s20   ;;  %s850_s19 = sphi %s907_s19, %s1155_s19   ;;  %s846_s18 = sphi %s905_s18, %s1154_s18  }
   0x7   : > { %s34_s26 = sadd.s32 1, %s862_s22  ;;  %s113_s27 = sadd.s32 1, %s854_s20 }
   0x8   : > { %p36_p0 = scmp.ge.s32.totalorder %s34_s26, 2  ;;  %p123_p1 = scmp.ne.s32.totalorder %s854_s20, %s850_s19 }
   0x9   : > { %p124_p2 = scmp.eq.s32.totalorder %s594_s24, 1  ;;  %p129_p3 = scmp.ne.s32.totalorder %s850_s19, %s846_s18 }
   0xa   : > { %s1160_s26 = smov (%p36_p0, %s34_s26), 0  ;;  %p130_p5 = scmp.eq.s32.totalorder %s1148_s25, 1 }
   0xb   : > { %p947_p4 = por %p124_p2, %p123_p1  ;;  %s108_s29 = ssub.s32 %s862_s22, %s1160_s26 }
   0xc   : > { %p598_p6 = scmp.ge.s32.totalorder %s866_s23, 1  ;;  %p111_p7 = scmp.eq.s32.totalorder %s108_s29, 0 }
   0xd   : > { %p956_p8 = por %p130_p5, %p129_p3  ;;  %p220_p9 = scmp.lt.s32.totalorder %s866_s23, 3 }
   0xe   : > { %s962_s6 = scalar_select %p111_p7, %s854_s20, %s113_s27  }
   0xf   : > { %p221_p10 = pnand %p598_p6, %p220_p9 }
  0x10   : > { %p260_p11 = scmp.lt.s32.totalorder (!%p221_p10), %s858_s21, 1  ;;  %s243_s10 = sand.u32 (!%p221_p10), 1, %s850_s19  }
  0x11   : > { %224 = sbr.rel (%p221_p10) target bundleno = 416 (0x1a0), region = 32  ;;  %s1019_s11 = sshll.u32 (!%p221_p10), %s243_s10, 3 }
  0x12   : > { %s245_s15 = scalar_lea.vmem (!%p221_p10), [#allocation2], %s1019_s11  ;;  %s870_s7 = smov (!%p221_p10), 96  }
  0x13   : > { %s432_s16 = sshll.u32 (!%p221_p10), %s245_s15, 4  ;;  %s1034_s16 = int_to_ptr.vmem [resolvable:$true] %s432_s16 }
  0x14   : > { %s734_s8 = scalar_lea.vmem (!%p221_p10), %s1034_s16, 128 }
  0x15   : > { %p735_p12 = scmp.ne.s32.totalorder (!%p221_p10), %s1034_s16, %s734_s8 }
  0x16   : > { %v279_v0 = vld [vmem:[%s1143_s1 + $0x58] sm:$0xff]  ;;  %vm287_vm0 = vcmask 261120   ;;  %v868_v1 = vmov 0.0   ;;  %vm869_vm1 = vmmov 0   ;;  %v278_v2 = vld [vmem:[%s1143_s1 + $0x50] sm:$0xff]  ;;  %v277_v3 = vld [vmem:[%s1143_s1 + $0x48] sm:$0xff] }
  0x17   : > { %638 = vmatprep.subr.mxu0 %v868_v1  ;;  %662 = vmatprep.mubr.msk.f32.mxu0 %vm869_vm1, %v868_v1  ;;  %v276_v4 = vld [vmem:[%s1143_s1 + $0x40] sm:$0xff]  ;;  %v275_v5 = vld [vmem:[%s1143_s1 + $0x38] sm:$0xff]  ;;  %v274_v6 = vld [vmem:[%s1143_s1 + $0x30] sm:$0xff]  ;;  %s261_s14 = scalar_select %p260_p11, %s858_s21, 1 }
  0x18   : > { %639 = vmatpush3.xpose.msk.msra.mxu0 %vm287_vm0, %v279_v0  ;;  %v273_v7 = vld [vmem:[%s1143_s1 + $0x28] sm:$0xff]  ;;  %v272_v8 = vld [vmem:[%s1143_s1 + $0x20] sm:$0xff]  ;;  %v271_v9 = vld [vmem:[%s1143_s1 + $0x18] sm:$0xff]  ;;  %p736_p13 = pnand %p735_p12, %p947_p4 }
  0x19   : > { %640 = vmatprep.subr.mxu0 %v868_v1  ;;  %v270_v10 = vld [vmem:[%s1143_s1 + $0x10] sm:$0xff]  ;;  %v269_v11 = vld [vmem:[%s1143_s1 + $0x8] sm:$0xff]  ;;  %s602_s17 = sshll.u32 %s261_s14, 3  ;;  %v268_v12 = vld [vmem:[%s1143_s1] sm:$0xff]  ;;  %s1025_s14 = sshll.u32 %s858_s21, 7 }
  0x1a   : > { %s266_s9 = scalar_lea.vmem %s1142_s0, %s602_s17  ;;  %v603_v14 = vld [vmem:[%s1144_s2] ss:$0 sm:$0xff]  ;;  %s1032_s29 = scalar_lea.hbm %s1145_s3, %s1025_s14 }
  0x1b   : > { %v267_v13 = vld [vmem:[%s266_s9] sm:$0xff]  ;;  %s408_s21 = scalar_lea.sflag [#allocation3], %s243_s10  ;;  %p737_p0 = pneg %p736_p13 }
  0x1c   : > { %641 = vmatpush3.xpose.msk.msra.mxu0 %vm287_vm0, %v278_v2  ;;  %s871_s9 = smov [#allocation2]  }
  0x1d   : > { %642 = vmatprep.subr.mxu0 %v868_v1  ;;  %s738_s12 = sshll.u32 %s871_s9, 4  ;;  %s739_s12 = int_to_ptr.vmem [resolvable:$false] %s738_s12 }
  0x1e   : > { %s740_s13 = scalar_lea.vmem %s739_s12, 256  ;;  %p741_p1 = scmp.lt.s32.totalorder %s1034_s16, %s739_s12 }
  0x1f   : > { %p742_p2 = scmp.lt.s32.totalorder %s740_s13, %s734_s8 }
  0x20   : > { %643 = vmatpush3.xpose.msk.msra.mxu0 %vm287_vm0, %v277_v3 }
  0x21   : > { %644 = vmatprep.subr.mxu0 %v868_v1  ;;  %p743_p3 = por %p742_p2, %p741_p1 }
  0x23   : > { %p744_p5 = pnand %p743_p3, %p737_p0 }
  0x24   : > { %645 = vmatpush3.xpose.msk.msra.mxu0 %vm287_vm0, %v276_v4 }
  0x25   : > { %646 = vmatprep.subr.mxu0 %v868_v1 }
  0x28   : > { %647 = vmatpush3.xpose.msk.msra.mxu0 %vm287_vm0, %v275_v5 }
  0x29   : > { %648 = vmatprep.subr.mxu0 %v868_v1 }
  0x2c   : > { %649 = vmatpush3.xpose.msk.msra.mxu0 %vm287_vm0, %v274_v6 }
  0x2d   : > { %650 = vmatprep.subr.mxu0 %v868_v1 }
  0x30   : > { %651 = vmatpush3.xpose.msk.msra.mxu0 %vm287_vm0, %v273_v7 }
  0x31   : > { %652 = vmatprep.subr.mxu0 %v868_v1 }
  0x34   : > { %653 = vmatpush3.xpose.msk.msra.mxu0 %vm287_vm0, %v272_v8 }
  0x35   : > { %654 = vmatprep.subr.mxu0 %v868_v1 }
  0x38   : > { %655 = vmatpush3.xpose.msk.msra.mxu0 %vm287_vm0, %v271_v9 }
  0x39   : > { %656 = vmatprep.subr.mxu0 %v868_v1 }
  0x3c   : > { %657 = vmatpush3.xpose.msk.msra.mxu0 %vm287_vm0, %v270_v10 }
  0x3d   : > { %658 = vmatprep.subr.mxu0 %v868_v1 }
  0x40   : > { %659 = vmatpush3.xpose.msk.msra.mxu0 %vm287_vm0, %v269_v11 }
  0x41   : > { %660 = vmatprep.subr.mxu0 %v868_v1 }
  0x44   : > { %661 = vmatpush3.xpose.msk.msra.mxu0 %vm287_vm0, %v268_v12 }
  0x47   : > { %663 = vmatmul.mubr.msk.f32.vlgmr.msra.gmra.mxu0 %vm287_vm0, %v267_v13 }
 0x107   : > { %v393_v15 = vpop.f32.mrf.mxu0 }
 0x108   : > { %v394_v16 = vadd.f32 %v603_v14, %v393_v15 }
 0x109   : > { %v664_v17 = vpop.f32.mrf.mxu0 }
 0x10a   : > { %399 = vrot.lane.b32.xlu0 %v394_v16, %s870_s7  ;;  %397 = vst.msk [vmem:[%s245_s15] sm:$0xff] %vm287_vm0, %v394_v16 }
 0x10b   : > { %747 = shalt.err (!%p744_p5)
}
 0x10c   : > { %s748_s15 = scalar_lea.hbm %s1032_s29, 128  ;;  %s752_s27 = scalar_lea.hbm %s1145_s3, 256 }
 0x10d   : > { %p749_p6 = scmp.ne.s32.totalorder %s1032_s29, %s748_s15  ;;  %p753_p10 = scmp.lt.s32.totalorder %s1032_s29, %s1145_s3 }
 0x10e   : > { %p754_p11 = scmp.lt.s32.totalorder %s752_s27, %s748_s15 }
 0x10f   : > { %p750_p7 = pnand %p749_p6, %p947_p4 }
 0x110   : > { %p755_p12 = por %p754_p11, %p753_p10 }
 0x111   : > { %p751_p9 = pneg %p750_p7 }
 0x113   : > { %p756_p13 = pnand %p755_p12, %p751_p9 }
 0x115   : > { %759 = shalt.err (!%p756_p13)
}
 0x116   : > { %665 = dma.vmem_to_hbm [thread:$0]  (%p947_p4), %s1034_s16, 128, %s1032_s29, %s408_s21  }
 0x117   : > { %s872_s8 = smov 64   ;;  %s1059_s12 = sand.u32 1, %s594_s24  }
 0x118   : > { %403 = vrot.lane.b32.xlu0 %v394_v16, %s872_s8  ;;  %s252_s13 = scalar_lea.vmem [#allocation4], %s1019_s11  ;;  %s1066_s27 = scalar_lea.hbm %s1146_s4, %s1025_s14 }
 0x119   : > { %s446_s15 = sshll.u32 %s252_s13, 4  ;;  %s1149_s16 = scalar_lea.vmem [#allocation6], %s1019_s11  ;;  %s1068_s15 = int_to_ptr.vmem [resolvable:$true] %s446_s15 }
 0x11a   : > { %s460_s29 = sshll.u32 %s1149_s16, 4  ;;  %s413_s24 = scalar_lea.sflag [#allocation5], %s1059_s12  ;;  %s461_s29 = int_to_ptr.vmem [resolvable:$true] %s460_s29 }
 0x11b   : > { %s760_s21 = scalar_lea.vmem %s1068_s15, 128  ;;  %s873_s7 = smov [#allocation4]  }
 0x11c   : > { %p761_p0 = scmp.ne.s32.totalorder %s1068_s15, %s760_s21  ;;  %s764_s9 = sshll.u32 %s873_s7, 4  ;;  %s765_s9 = int_to_ptr.vmem [resolvable:$false] %s764_s9 }
 0x11d   : > { %s766_s8 = scalar_lea.vmem %s765_s9, 256  ;;  %p767_p3 = scmp.lt.s32.totalorder %s1068_s15, %s765_s9 }
 0x11e   : > { %p762_p1 = pnand %p761_p0, %p947_p4  ;;  %p768_p5 = scmp.lt.s32.totalorder %s766_s8, %s760_s21 }
 0x120   : > { %p763_p2 = pneg %p762_p1  ;;  %p769_p6 = por %p768_p5, %p767_p3 }
 0x122   : > { %p770_p7 = pnand %p769_p6, %p763_p2 }
 0x17c   : > { %v400_v18 = vpop.permute.xlu0 %399 }
 0x17d   : > { %402 = vst.msk [vmem:[%s252_s13] sm:$0xff] %vm287_vm0, %v400_v18 }
 0x17e   : > { %773 = shalt.err (!%p770_p7)
}
 0x17f   : > { %s774_s13 = scalar_lea.hbm %s1066_s27, 128  ;;  %s778_s7 = scalar_lea.hbm %s1146_s4, 256 }
 0x180   : > { %p775_p9 = scmp.ne.s32.totalorder %s1066_s27, %s774_s13  ;;  %p779_p12 = scmp.lt.s32.totalorder %s1066_s27, %s1146_s4 }
 0x181   : > { %p780_p13 = scmp.lt.s32.totalorder %s778_s7, %s774_s13 }
 0x182   : > { %p776_p10 = pnand %p775_p9, %p947_p4 }
 0x183   : > { %p781_p0 = por %p780_p13, %p779_p12 }
 0x184   : > { %p777_p11 = pneg %p776_p10 }
 0x186   : > { %p782_p1 = pnand %p781_p0, %p777_p11 }
 0x188   : > { %785 = shalt.err (!%p782_p1)
}
 0x189   : > { %666 = dma.vmem_to_hbm [thread:$0]  (%p947_p4), %s1068_s15, 128, %s1066_s27, %s413_s24  }
 0x18a   : > { %s458_s25 = scalar_lea.hbm %s1147_s5, %s1025_s14  ;;  %v404_v19 = vpop.permute.xlu0 %403  ;;  %s1152_s16 = scalar_lea.vmem [#allocation6], %s1019_s11 }
 0x18b   : > { %406 = vst.msk [vmem:[%s1152_s16] sm:$0xff] %vm287_vm0, %v404_v19  ;;  %s786_s8 = scalar_lea.vmem %s461_s29, 128  ;;  %s874_s13 = smov [#allocation6]  }
 0x18c   : > { %p787_p2 = scmp.ne.s32.totalorder %s461_s29, %s786_s8  ;;  %s790_s10 = sshll.u32 %s874_s13, 4  ;;  %s791_s10 = int_to_ptr.vmem [resolvable:$false] %s790_s10 }
 0x18d   : > { %s792_s17 = scalar_lea.vmem %s791_s10, 256  ;;  %p793_p6 = scmp.lt.s32.totalorder %s461_s29, %s791_s10 }
 0x18e   : > { %p788_p3 = pnand %p787_p2, %p947_p4  ;;  %p794_p7 = scmp.lt.s32.totalorder %s792_s17, %s786_s8 }
 0x190   : > { %p789_p5 = pneg %p788_p3  ;;  %p795_p9 = por %p794_p7, %p793_p6 }
 0x192   : > { %p796_p10 = pnand %p795_p9, %p789_p5 }
 0x194   : > { %799 = shalt.err (!%p796_p10)
}
 0x195   : > { %s800_s15 = scalar_lea.hbm %s458_s25, 128  ;;  %s804_s27 = scalar_lea.hbm %s1147_s5, 256 }
 0x196   : > { %p801_p11 = scmp.ne.s32.totalorder %s458_s25, %s800_s15  ;;  %p805_p0 = scmp.lt.s32.totalorder %s458_s25, %s1147_s5 }
 0x197   : > { %p806_p1 = scmp.lt.s32.totalorder %s804_s27, %s800_s15 }
 0x198   : > { %p802_p12 = pnand %p801_p11, %p947_p4 }
 0x199   : > { %p807_p2 = por %p806_p1, %p805_p0 }
 0x19a   : > { %p803_p13 = pneg %p802_p12 }
 0x19c   : > { %p808_p3 = pnand %p807_p2, %p803_p13 }
 0x19e   : > { %811 = shalt.err (!%p808_p3)
}
 0x19f   : > { %667 = dma.vmem_to_hbm [thread:$0]  (%p947_p4), %s461_s29, 128, %s458_s25, %s413_s24  }
 0x1a0 PF: > { %p681_p5 = scmp.ge.s32.totalorder %s866_s23, 2  ;;  %s472_s9 = sand.u32 1, %s846_s18  }
 0x1a1   : > { %s473_s16 = scalar_lea.sflag [#allocation3], %s472_s9 }
 0x1a2   : > { %p672_p6 = pnand %p681_p5, %p956_p8 }
 0x1a4   : > { %p673_p7 = pneg %p672_p6 }
 0x1a6   : > { %837 = dma.done.wait (%p673_p7), %s473_s16, 128  }
 0x1a7   : > { %839 = vsyncadd (%p673_p7), %s473_s16, 4294967168  ;;  %s1153_s8 = sadd.s32 4294967294, %s866_s23  }
 0x1a8   : > { %s481_s13 = sand.u32 1, %s1153_s8  }
 0x1a9   : > { %s482_s10 = scalar_lea.sflag [#allocation5], %s481_s13 }
 0x1aa   : > { %841 = dma.done.wait (%p673_p7), %s482_s10, 256  }
 0x1ab   : > { %843 = vsyncadd (%p673_p7), %s482_s10, 4294967040  ;;  %s22_s23 = sadd.s32 1, %s866_s23   ;;  %s1154_s18 = smov %s850_s19 }
 0x1ac   : > { %p19_p4 = scmp.ge.s32.totalorder %s22_s23, 4   ;;  %s1155_s19 = smov %s854_s20 }
 0x1ad   : > { %s1156_s20 = smov %s962_s6  ;;  %s1157_s21 = smov %s862_s22 }
 0x1ae   : > { %s1158_s22 = smov %s1160_s26  ;;  %21 = sbr.rel (!%p19_p4) target bundleno = 6 (0x6), region = 99 }
 0x1b3   :  { %496 = vsyncpa [#allocation3], 1 }
 0x1b4   :  { %498 = vsyncpa [#allocation3 + $0x1], 1 }
 0x1b5   :  { %499 = vsyncpa [#allocation5], 1 }
 0x1b6   :  { %501 = vsyncpa [#allocation5 + $0x1], 1 }

</bundles_post_ra>
